<compile_context>
chip_gen: v6e
topology: v6e:2x2x1
jax: 0.10.0
libtpu: 0.0.40
codegen_flags: <defaults>
</compile_context>

<pallas_src>
import functools

import jax
import jax.numpy as jnp
from jax.experimental import pallas as pl
from jax.experimental.pallas import tpu as pltpu


def _round_up(x, m):
    return ((x + m - 1) // m) * m


def _hw_vmem_bytes():
    """Physical VMEM per TensorCore; conservative fallback if undetectable."""
    try:
        return int(pltpu.get_tpu_info().vmem_capacity_bytes)
    except Exception:
        return 64 << 20          # assume v7x-sized VMEM when unsure


def _rows_budget(E, key_itemsize, cd_itemsize, H1p, H2p, vmem_budget_bytes):
    """Rough per-key-row VMEM footprint -> max rows per grid step."""
    per_row = (2 * E * key_itemsize        # keys block, double buffered
               + 2 * E * 4                 # f32 keys + q*k product
               + 2 * E * cd_itemsize       # fused [k | q*k] MXU operand
               + H1p * (8 + cd_itemsize)   # layer-1 acc f32 + h1 f32/cd
               + H2p * 4                   # h2
               + 32)                       # score / mask / misc
    return max(8, int(vmem_budget_bytes) // per_row)


def _choose_tiles(B, T, rows_cap):
    """Pick (TB, TT, B_pad, T_pad).

    TB/TT are multiples of 8 that divide the 8-rounded extents, so padding is
    at most 7 rows on each axis and the in-kernel reshapes are layout-free.
    When round_up(B,8) >= 16 we keep >= 2 batch grid steps so the "parallel"
    batch axis can use both v7x TensorCores.
    """
    B8 = _round_up(B, 8)
    T8 = _round_up(T, 8)

    tb_cap = B8 if B8 < 16 else max(8, ((B8 // 2) // 8) * 8)
    tb_cap = min(tb_cap, 256)
    tb = 8
    for cand in range(8, tb_cap + 1, 8):
        if B8 % cand == 0:
            tb = cand

    tt_cap = max(8, min(T8, (max(rows_cap, 8) // tb) // 8 * 8))
    tt = 8
    for cand in range(8, tt_cap + 1, 8):
        if T8 % cand == 0:
            tt = cand
    return tb, tt, B8, T8


def _din_attention_kernel(q_ref, k_ref, klen_ref,
                          wq_ref, wkp_ref, b1_ref,
                          w2_ref, b2_ref, w3_ref, b3_ref,
                          o_ref, acc_ref, *, compute_dtype):
    """One (batch tile, T tile) step of DIN attention pooling.

    q_ref    : (TB, E)       native dtype, queries ((B,1,E) squeezed)
    k_ref    : (TB, TT, E)   native dtype, behaviour-key tile
    klen_ref : (TB, 1)  i32  keys_length per batch row
    wq       : (E, H1p)   cd   folded layer-1 weight applied to q
    wkp      : (2E, H1p)  cd   stacked [W1b-W1c ; W1d] applied to [k | q*k]
    b1 (1,H1p) f32   w2 (H1p,H2p) cd   b2 (1,H2p) f32
    w3 (1,H2p) f32   b3 (1,1) f32
    o_ref    : (TB, E) f32   pooled output (written on the last T step)
    acc_ref  : (TB, E) f32   VMEM scratch, pooled-sum accumulator over T tiles
    """
    cd = compute_dtype
    t_step = pl.program_id(1)

    @pl.when(t_step == 0)
    def _():
        acc_ref[...] = jnp.zeros_like(acc_ref)

    q = q_ref[...].astype(jnp.float32)                    # (TB, E)
    keys3 = k_ref[...].astype(jnp.float32)                # (TB, TT, E)
    TB, TT, E = keys3.shape
    H1p = wq_ref.shape[1]

    keys2 = keys3.reshape(TB * TT, E)
    prod2 = (q[:, None, :] * keys3).reshape(TB * TT, E)   # q*k rows (f32, VPU)
    kp2 = jnp.concatenate([keys2, prod2], axis=-1)        # (TB*TT, 2E)

    # LocalActivationUnit layer 1 (fused):
    #   cat([q,k,q-k,q*k]) @ W1 == q@(W1a+W1c) + [k | q*k] @ [W1b-W1c ; W1d]
    qw = jnp.dot(q.astype(cd), wq_ref[...],
                 preferred_element_type=jnp.float32)                    # (TB, H1p)
    kpw = jnp.dot(kp2.astype(cd), wkp_ref[...],
                  preferred_element_type=jnp.float32)                   # (TB*TT, H1p)

    h1 = jax.nn.sigmoid(
        (kpw + b1_ref[...]).reshape(TB, TT, H1p) + qw[:, None, :]
    ).reshape(TB * TT, H1p)

    # layer 2 + sigmoid
    h2 = jax.nn.sigmoid(
        jnp.dot(h1.astype(cd), w2_ref[...],
                preferred_element_type=jnp.float32) + b2_ref[...])      # (TB*TT, H2p)

    # dense Linear(H2 -> 1): VPU multiply + lane reduce (no N=1 MXU push)
    score = jnp.sum(h2 * w3_ref[...], axis=-1, keepdims=True) + b3_ref[...]
    score3 = score.reshape(TB, TT, 1)

    # length mask built in-register; weight_normalization=False -> zero padding
    t_idx = jax.lax.broadcasted_iota(jnp.int32, (TB, TT, 1), 1) + t_step * TT
    klen = klen_ref[...][:, :, None]                      # (TB, 1, 1)
    w_att = jnp.where(t_idx < klen, score3, jnp.zeros_like(score3))

    # pooled[b] += sum_t w_att[b,t] * keys[b,t,:]  (VPU mul + sublane reduce)
    acc_ref[...] += jnp.sum(w_att * keys3, axis=1)

    @pl.when(t_step == pl.num_programs(1) - 1)
    def _():
        # TODO(synk): optional lane-dense (1, TB*E) output slab if vst.msk
        # shows up in the bundle dump; output bytes are tiny so low priority.
        o_ref[...] = acc_ref[...].astype(o_ref.dtype)


def _prepare_kernel_params(params, E, compute_dtype):
    """Fold the concat matmul, stack the two row-matmul weights into one
    (2E, H1p) operand, zero-pad hidden dims to 128 lanes, and cast the MXU
    weights to the compute dtype. Zero padding keeps the maths exact: padded
    H1/H2 lanes become sigmoid(0)=0.5 but always meet zero rows/cols downstream.
    """
    w1, b1, w2, b2, w3, b3 = params
    H1 = w1.shape[1]
    H2 = w2.shape[1]
    H1p = _round_up(H1, 128)
    H2p = _round_up(H2, 128)

    w1a, w1b, w1c, w1d = w1[:E], w1[E:2 * E], w1[2 * E:3 * E], w1[3 * E:]
    pad_c = lambda m, n: jnp.pad(m, ((0, 0), (0, n - m.shape[1])))

    wq = pad_c(w1a + w1c, H1p).astype(compute_dtype)            # applied to q
    wkp = jnp.concatenate([pad_c(w1b - w1c, H1p),               # applied to k
                           pad_c(w1d, H1p)],                    # applied to q*k
                          axis=0).astype(compute_dtype)         # (2E, H1p)
    b1p = pad_c(b1.reshape(1, H1).astype(jnp.float32), H1p)
    w2p = jnp.pad(w2, ((0, H1p - H1), (0, H2p - H2))).astype(compute_dtype)
    b2p = pad_c(b2.reshape(1, H2).astype(jnp.float32), H2p)
    w3p = pad_c(w3.reshape(1, H2).astype(jnp.float32), H2p)     # (H2,1) -> row vec
    b3p = b3.reshape(1, 1).astype(jnp.float32)
    return (wq, wkp, b1p, w2p, b2p, w3p, b3p), H1p, H2p, H1, H2


def attention_sequence_pooling(query, keys, keys_length, params, *,
                               compute_dtype=jnp.bfloat16,
                               block_b=None, block_t=None,
                               keys_buffers=None):
    """query (B,1,E), keys (B,T,E), keys_length (B,)/(B,1) int -> (B,1,E) f32.

    compute_dtype (default bfloat16) only affects the MXU matmul operands
    (f32 accumulation); mask, q*k product and pooling always stay in f32.
    keys are streamed in their native dtype. keys_buffers=3 enables a third
    pipeline buffer on the keys stream if its DMA is exposed.
    """
    B, T, E = keys.shape
    assert query.shape == (B, 1, E)

    (wq, wkp, b1p, w2p, b2p, w3p, b3p), H1p, H2p, H1, H2 = _prepare_kernel_params(
        params, E, compute_dtype)

    # Generation-aware tile sizing: big tiles + raised vmem limit on the
    # 128 MiB-VMEM parts (v5e/v6e), capped on v7x's 64 MiB VMEM.
    phys_vmem = _hw_vmem_bytes()
    if phys_vmem >= (100 << 20):
        rows_cap, vmem_limit = 8192, 96 << 20
    else:
        rows_cap, vmem_limit = 4096, 40 << 20
    vmem_limit = min(vmem_limit, phys_vmem * 3 // 4)

    cd_size = jnp.dtype(compute_dtype).itemsize
    rows_cap = min(rows_cap,
                   _rows_budget(E, keys.dtype.itemsize, cd_size, H1p, H2p,
                                vmem_limit * 6 // 10))

    TB, TT, B_pad, T_pad = _choose_tiles(B, T, rows_cap)
    if block_b is not None:
        TB = block_b
        B_pad = _round_up(B, TB)
    if block_t is not None:
        TT = block_t
        T_pad = _round_up(T, TT)

    # Keys stay in their native dtype (cast in-kernel); pad ONLY when the
    # mod-8 round-up actually changes the shape (no gratuitous HBM copy).
    keys_in = keys
    if B_pad != B or T_pad != T:
        keys_in = jnp.pad(keys, ((0, B_pad - B), (0, T_pad - T), (0, 0)))
    q_in = query.reshape(B, E)
    if B_pad != B:
        q_in = jnp.pad(q_in, ((0, B_pad - B), (0, 0)))
    kl = keys_length.reshape(-1).astype(jnp.int32).reshape(B, 1)
    if B_pad != B:
        kl = jnp.pad(kl, ((0, B_pad - B), (0, 0)))   # pad rows: len 0 -> masked out

    if keys_buffers is None:
        keys_spec = pl.BlockSpec((TB, TT, E), lambda i, t: (i, t, 0))
    else:
        keys_spec = pl.BlockSpec((TB, TT, E), lambda i, t: (i, t, 0),
                                 pipeline_mode=pl.Buffered(keys_buffers))

    def full(shape):
        return pl.BlockSpec(shape, lambda i, t, _s=shape: (0,) * len(_s))

    grid = (B_pad // TB, T_pad // TT)
    grid_spec = pltpu.PrefetchScalarGridSpec(
        num_scalar_prefetch=0,
        grid=grid,
        in_specs=[
            pl.BlockSpec((TB, E), lambda i, t: (i, 0)),     # query rows
            keys_spec,                                      # keys tile
            pl.BlockSpec((TB, 1), lambda i, t: (i, 0)),     # length per batch row
            full((E, H1p)), full((2 * E, H1p)), full((1, H1p)),
            full((H1p, H2p)), full((1, H2p)),
            full((1, H2p)), full((1, 1)),
        ],
        out_specs=pl.BlockSpec((TB, E), lambda i, t: (i, 0)),
        scratch_shapes=[pltpu.VMEM((TB, E), jnp.float32)],
    )

    rows = B_pad * T_pad
    weight_bytes = sum(int(a.size) * a.dtype.itemsize
                       for a in (wq, wkp, b1p, w2p, b2p, w3p, b3p))
    cost = pl.CostEstimate(
        flops=int(rows * E                           # q*k product
                  + 2 * rows * (2 * E) * H1p         # fused [k|q*k] @ Wkp
                  + 2 * B_pad * E * H1p              # q @ Wq (per batch row)
                  + 2 * rows * H1p * H2p             # h1 @ W2
                  + 2 * rows * H2p                   # dense reduce
                  + 2 * rows * E),                   # masked pooling
        transcendentals=int(rows * (H1 + H2)),
        bytes_accessed=int(keys_in.size * keys_in.dtype.itemsize
                           + q_in.size * q_in.dtype.itemsize
                           + kl.size * 4 + B_pad * E * 4 + weight_bytes),
    )

    out = pl.pallas_call(
        functools.partial(_din_attention_kernel, compute_dtype=compute_dtype),
        out_shape=jax.ShapeDtypeStruct((B_pad, E), jnp.float32),
        grid_spec=grid_spec,
        compiler_params=pltpu.CompilerParams(
            dimension_semantics=("parallel", "arbitrary"),
            vmem_limit_bytes=int(vmem_limit)),
        cost_estimate=cost,
    )(q_in, keys_in, kl, wq, wkp, b1p, w2p, b2p, w3p, b3p)

    return out[:B].reshape(B, 1, E)


def make_params(key, E, H1=80, H2=40):
    """Deterministic synthetic parameters, stored PyTorch-Linear-style as (in,out)."""
    ks = jax.random.split(key, 6)
    w1 = jax.random.normal(ks[0], (4 * E, H1), jnp.float32) * 0.1
    b1 = jax.random.normal(ks[1], (H1,), jnp.float32) * 0.1
    w2 = jax.random.normal(ks[2], (H1, H2), jnp.float32) * 0.1
    b2 = jax.random.normal(ks[3], (H2,), jnp.float32) * 0.1
    w3 = jax.random.normal(ks[4], (H2, 1), jnp.float32) * 0.1
    b3 = jax.random.normal(ks[5], (1,), jnp.float32) * 0.1
    return (w1, b1, w2, b2, w3, b3)


def reference(query, keys, keys_length, params):
    """Pure-JAX reference mirroring the PyTorch forward (default config)."""
    w1, b1, w2, b2, w3, b3 = params
    B, T, E = keys.shape
    queries = jnp.broadcast_to(query, keys.shape)
    att_in = jnp.concatenate([queries, keys, queries - keys, queries * keys], axis=-1)
    h1 = jax.nn.sigmoid(att_in @ w1 + b1)
    h2 = jax.nn.sigmoid(h1 @ w2 + b2)
    score = h2 @ w3 + b3                                          # (B, T, 1)
    outputs = jnp.transpose(score, (0, 2, 1))                     # (B, 1, T)
    mask = jnp.arange(T)[None, None, :] < keys_length.reshape(-1, 1, 1)
    outputs = jnp.where(mask, outputs, jnp.zeros_like(outputs))
    return jnp.matmul(outputs, keys)                              # (B, 1, E)


if __name__ == "__main__":
    # Case 1: module defaults (embedding_dim=4), tiny shapes.
    B, T, E = 2, 8, 4
    key = jax.random.PRNGKey(0)
    kq, kk, kp = jax.random.split(key, 3)

    query = jax.random.normal(kq, (B, 1, E), jnp.float32)
    keys = jax.random.normal(kk, (B, T, E), jnp.float32)
    keys_length = jnp.array([5, 8], dtype=jnp.int32)              # (B,)
    params = make_params(kp, E)

    ref = reference(query, keys, keys_length, params)

    # exact-semantics f32 MXU-operand path
    out_f32 = attention_sequence_pooling(query, keys, keys_length, params,
                                         compute_dtype=jnp.float32)
    out_f32 = jax.block_until_ready(out_f32)
    assert out_f32.shape == (B, 1, E)
    assert jnp.allclose(out_f32, ref, atol=1e-4, rtol=1e-4), (out_f32, ref)

    # default bf16 MXU-operand path (v5e/v6e/v7x throughput), looser tolerance
    out_bf16 = attention_sequence_pooling(query, keys, keys_length, params)
    out_bf16 = jax.block_until_ready(out_bf16)
    assert jnp.allclose(out_bf16, ref, atol=5e-2, rtol=5e-2), (out_bf16, ref)

    # Case 2: exercise batch padding, the 2-D (batch, T) grid and the
    # resident pooled accumulator with explicit small tiles.
    B2, T2, E2 = 10, 24, 4
    k2 = jax.random.PRNGKey(1)
    kq2, kk2, kl2, kp2 = jax.random.split(k2, 4)
    query2 = jax.random.normal(kq2, (B2, 1, E2), jnp.float32)
    keys2 = jax.random.normal(kk2, (B2, T2, E2), jnp.float32)
    keys_length2 = jax.random.randint(kl2, (B2, 1), 1, T2 + 1).astype(jnp.int32)
    params2 = make_params(kp2, E2)

    ref2 = reference(query2, keys2, keys_length2, params2)
    out2 = attention_sequence_pooling(query2, keys2, keys_length2, params2,
                                      compute_dtype=jnp.float32,
                                      block_b=8, block_t=8)
    out2 = jax.block_until_ready(out2)
    assert jnp.allclose(out2, ref2, atol=1e-4, rtol=1e-4), (out2, ref2)

    print("KERNEL_OK")
</pallas_src>

<mosaic_0001>
module attributes {stable_mosaic.version = 11 : i64} {
  func.func @_din_attention_kernel(%arg0: i32, %arg1: i32, %arg2: memref<8x4xf32, #tpu.memory_space<vmem>>, %arg3: memref<8x8x4xf32, #tpu.memory_space<vmem>>, %arg4: memref<8x1xi32, #tpu.memory_space<vmem>>, %arg5: memref<4x128xf32, #tpu.memory_space<vmem>>, %arg6: memref<8x128xf32, #tpu.memory_space<vmem>>, %arg7: memref<1x128xf32, #tpu.memory_space<vmem>>, %arg8: memref<128x128xf32, #tpu.memory_space<vmem>>, %arg9: memref<1x128xf32, #tpu.memory_space<vmem>>, %arg10: memref<1x128xf32, #tpu.memory_space<vmem>>, %arg11: memref<1x1xf32, #tpu.memory_space<vmem>>, %arg12: memref<8x4xf32, #tpu.memory_space<vmem>>, %arg13: memref<8x4xf32, #tpu.memory_space<vmem>>) attributes {dimension_semantics = [#tpu.dimension_semantics<parallel>, #tpu.dimension_semantics<arbitrary>], iteration_bounds = array<i64: 1, 1>, scalar_prefetch = 0 : i64, scratch_operands = 1 : i64, tpu.core_type = #tpu.core_type<tc>, window_params = [{transform_indices = @transform_0, window_bounds = array<i64: 8, 4>}, {transform_indices = @transform_1, window_bounds = array<i64: 8, 8, 4>}, {transform_indices = @transform_2, window_bounds = array<i64: 8, 1>}, {pipeline_mode = #tpu.pipeline_mode<synchronous>, transform_indices = @transform_3, window_bounds = array<i64: 4, 128>}, {pipeline_mode = #tpu.pipeline_mode<synchronous>, transform_indices = @transform_4, window_bounds = array<i64: 8, 128>}, {pipeline_mode = #tpu.pipeline_mode<synchronous>, transform_indices = @transform_5, window_bounds = array<i64: 1, 128>}, {pipeline_mode = #tpu.pipeline_mode<synchronous>, transform_indices = @transform_6, window_bounds = array<i64: 128, 128>}, {pipeline_mode = #tpu.pipeline_mode<synchronous>, transform_indices = @transform_7, window_bounds = array<i64: 1, 128>}, {pipeline_mode = #tpu.pipeline_mode<synchronous>, transform_indices = @transform_8, window_bounds = array<i64: 1, 128>}, {pipeline_mode = #tpu.pipeline_mode<synchronous>, transform_indices = @transform_9, window_bounds = array<i64: 1, 1>}, {transform_indices = @transform_10, window_bounds = array<i64: 8, 4>}]} {
    %c0_i32 = arith.constant 0 : i32
    %0 = arith.cmpi eq, %arg1, %c0_i32 : i32
    %1 = arith.extui %0 : i1 to i32
    %c0_i32_0 = arith.constant 0 : i32
    %2 = arith.cmpi ne, %1, %c0_i32_0 : i32
    scf.if %2 {
      %cst_34 = arith.constant 0.000000e+00 : f32
      %66 = vector.broadcast %cst_34 : f32 to vector<8x4xf32>
      %c0_35 = arith.constant 0 : index
      %c0_36 = arith.constant 0 : index
      %67 = vector.load %arg13[%c0_35, %c0_36] : memref<8x4xf32, #tpu.memory_space<vmem>>, vector<8x4xf32>
      tpu.vector_store %arg13[%c0_35, %c0_36], %66 {strides = array<i32>} : memref<8x4xf32, #tpu.memory_space<vmem>>, vector<8x4xf32>,
    } else {
    }
    %c0 = arith.constant 0 : index
    %c0_1 = arith.constant 0 : index
    %3 = vector.load %arg2[%c0, %c0_1] : memref<8x4xf32, #tpu.memory_space<vmem>>, vector<8x4xf32>
    %c0_2 = arith.constant 0 : index
    %c0_3 = arith.constant 0 : index
    %c0_4 = arith.constant 0 : index
    %4 = vector.load %arg3[%c0_2, %c0_3, %c0_4] : memref<8x8x4xf32, #tpu.memory_space<vmem>>, vector<8x8x4xf32>
    %5 = vector.shape_cast %4 : vector<8x8x4xf32> to vector<64x4xf32>
    %6 = vector.shape_cast %3 : vector<8x4xf32> to vector<8x1x4xf32>
    %7 = vector.broadcast %6 : vector<8x1x4xf32> to vector<8x8x4xf32>
    %8 = arith.mulf %7, %4 : vector<8x8x4xf32>
    %9 = vector.shape_cast %8 : vector<8x8x4xf32> to vector<64x4xf32>
    %10 = tpu.concatenate %5, %9 in 1 : vector<64x4xf32>, vector<64x4xf32> -> vector<64x8xf32>
    %c0_5 = arith.constant 0 : index
    %c0_6 = arith.constant 0 : index
    %11 = vector.load %arg5[%c0_5, %c0_6] : memref<4x128xf32, #tpu.memory_space<vmem>>, vector<4x128xf32>
    %cst = arith.constant dense<0.000000e+00> : vector<8x128xf32>
    %12 = tpu.matmul %3, %11, %cst {dimension_numbers = #tpu.dot_dimension_numbers<[1], [0], [0], [1], [0, 0, 1, 1], [], []>} : vector<8x4xf32>, vector<4x128xf32>, vector<8x128xf32> -> vector<8x128xf32>
    %c0_7 = arith.constant 0 : index
    %c0_8 = arith.constant 0 : index
    %13 = vector.load %arg6[%c0_7, %c0_8] : memref<8x128xf32, #tpu.memory_space<vmem>>, vector<8x128xf32>
    %cst_9 = arith.constant dense<0.000000e+00> : vector<64x128xf32>
    %14 = tpu.matmul %10, %13, %cst_9 {dimension_numbers = #tpu.dot_dimension_numbers<[1], [0], [0], [1], [0, 0, 1, 1], [], []>} : vector<64x8xf32>, vector<8x128xf32>, vector<64x128xf32> -> vector<64x128xf32>
    %c0_10 = arith.constant 0 : index
    %c0_11 = arith.constant 0 : index
    %15 = vector.load %arg7[%c0_10, %c0_11] : memref<1x128xf32, #tpu.memory_space<vmem>>, vector<1x128xf32>
    %16 = vector.broadcast %15 : vector<1x128xf32> to vector<64x128xf32>
    %17 = arith.addf %14, %16 : vector<64x128xf32>
    %18 = vector.shape_cast %17 : vector<64x128xf32> to vector<8x8x128xf32>
    %19 = vector.shape_cast %12 : vector<8x128xf32> to vector<8x1x128xf32>
    %20 = vector.broadcast %19 : vector<8x1x128xf32> to vector<8x8x128xf32>
    %21 = arith.addf %18, %20 : vector<8x8x128xf32>
    %22 = arith.negf %21 : vector<8x8x128xf32>
    %23 = math.exp %22 : vector<8x8x128xf32>
    %cst_12 = arith.constant 1.000000e+00 : f32
    %24 = vector.broadcast %cst_12 : f32 to vector<8x8x128xf32>
    %25 = arith.addf %24, %23 : vector<8x8x128xf32>
    %26 = arith.divf %24, %25 : vector<8x8x128xf32>
    %27 = vector.shape_cast %26 : vector<8x8x128xf32> to vector<64x128xf32>
    %c0_13 = arith.constant 0 : index
    %c0_14 = arith.constant 0 : index
    %28 = vector.load %arg8[%c0_13, %c0_14] : memref<128x128xf32, #tpu.memory_space<vmem>>, vector<128x128xf32>
    %cst_15 = arith.constant dense<0.000000e+00> : vector<64x128xf32>
    %29 = tpu.matmul %27, %28, %cst_15 {dimension_numbers = #tpu.dot_dimension_numbers<[1], [0], [0], [1], [0, 0, 1, 1], [], []>} : vector<64x128xf32>, vector<128x128xf32>, vector<64x128xf32> -> vector<64x128xf32>
    %c0_16 = arith.constant 0 : index
    %c0_17 = arith.constant 0 : index
    %30 = vector.load %arg9[%c0_16, %c0_17] : memref<1x128xf32, #tpu.memory_space<vmem>>, vector<1x128xf32>
    %31 = vector.broadcast %30 : vector<1x128xf32> to vector<64x128xf32>
    %32 = arith.addf %29, %31 : vector<64x128xf32>
    %33 = arith.negf %32 : vector<64x128xf32>
    %34 = math.exp %33 : vector<64x128xf32>
    %cst_18 = arith.constant 1.000000e+00 : f32
    %35 = vector.broadcast %cst_18 : f32 to vector<64x128xf32>
    %36 = arith.addf %35, %34 : vector<64x128xf32>
    %37 = arith.divf %35, %36 : vector<64x128xf32>
    %c0_19 = arith.constant 0 : index
    %c0_20 = arith.constant 0 : index
    %38 = vector.load %arg10[%c0_19, %c0_20] : memref<1x128xf32, #tpu.memory_space<vmem>>, vector<1x128xf32>
    %39 = vector.broadcast %38 : vector<1x128xf32> to vector<64x128xf32>
    %40 = arith.mulf %37, %39 : vector<64x128xf32>
    %cst_21 = arith.constant dense<0.000000e+00> : vector<64xf32>
    %41 = vector.multi_reduction <add>, %40, %cst_21 [1] : vector<64x128xf32> to vector<64xf32>
    %42 = vector.shape_cast %41 : vector<64xf32> to vector<64x1xf32>
    %c0_22 = arith.constant 0 : index
    %c0_23 = arith.constant 0 : index
    %43 = vector.load %arg11[%c0_22, %c0_23] : memref<1x1xf32, #tpu.memory_space<vmem>>, vector<1x1xf32>
    %44 = vector.broadcast %43 : vector<1x1xf32> to vector<64x1xf32>
    %45 = arith.addf %42, %44 : vector<64x1xf32>
    %46 = vector.shape_cast %45 : vector<64x1xf32> to vector<8x8x1xf32>
    %47 = tpu.iota {dimensions = array<i32: 1>} : vector<8x8x1xi32>
    %c8_i32 = arith.constant 8 : i32
    %48 = arith.muli %arg1, %c8_i32 : i32
    %49 = vector.broadcast %48 : i32 to vector<8x8x1xi32>
    %50 = arith.addi %47, %49 : vector<8x8x1xi32>
    %c0_24 = arith.constant 0 : index
    %c0_25 = arith.constant 0 : index
    %51 = vector.load %arg4[%c0_24, %c0_25] : memref<8x1xi32, #tpu.memory_space<vmem>>, vector<8x1xi32>
    %52 = vector.shape_cast %51 : vector<8x1xi32> to vector<8x1x1xi32>
    %53 = vector.broadcast %52 : vector<8x1x1xi32> to vector<8x8x1xi32>
    %54 = arith.cmpi slt, %50, %53 : vector<8x8x1xi32>
    %cst_26 = arith.constant 0.000000e+00 : f32
    %55 = vector.broadcast %cst_26 : f32 to vector<8x8x1xf32>
    %56 = arith.select %54, %46, %55 : vector<8x8x1xi1>, vector<8x8x1xf32>
    %c0_27 = arith.constant 0 : index
    %c0_28 = arith.constant 0 : index
    %57 = vector.load %arg13[%c0_27, %c0_28] : memref<8x4xf32, #tpu.memory_space<vmem>>, vector<8x4xf32>
    %58 = vector.broadcast %56 : vector<8x8x1xf32> to vector<8x8x4xf32>
    %59 = arith.mulf %58, %4 : vector<8x8x4xf32>
    %cst_29 = arith.constant dense<0.000000e+00> : vector<8x4xf32>
    %60 = vector.multi_reduction <add>, %59, %cst_29 [1] : vector<8x8x4xf32> to vector<8x4xf32>
    %61 = arith.addf %57, %60 : vector<8x4xf32>
    %c0_30 = arith.constant 0 : index
    %c0_31 = arith.constant 0 : index
    %62 = vector.load %arg13[%c0_30, %c0_31] : memref<8x4xf32, #tpu.memory_space<vmem>>, vector<8x4xf32>
    tpu.vector_store %arg13[%c0_30, %c0_31], %61 {strides = array<i32>} : memref<8x4xf32, #tpu.memory_space<vmem>>, vector<8x4xf32>,
    %c0_i32_32 = arith.constant 0 : i32
    %63 = arith.cmpi eq, %arg1, %c0_i32_32 : i32
    %64 = arith.extui %63 : i1 to i32
    %c0_i32_33 = arith.constant 0 : i32
    %65 = arith.cmpi ne, %64, %c0_i32_33 : i32
    scf.if %65 {
      %c0_34 = arith.constant 0 : index
      %c0_35 = arith.constant 0 : index
      %66 = vector.load %arg13[%c0_34, %c0_35] : memref<8x4xf32, #tpu.memory_space<vmem>>, vector<8x4xf32>
      %c0_36 = arith.constant 0 : index
      %c0_37 = arith.constant 0 : index
      %67 = vector.load %arg12[%c0_36, %c0_37] : memref<8x4xf32, #tpu.memory_space<vmem>>, vector<8x4xf32>
      tpu.vector_store %arg12[%c0_36, %c0_37], %66 {strides = array<i32>} : memref<8x4xf32, #tpu.memory_space<vmem>>, vector<8x4xf32>,
    } else {
    }
    return
  }
  func.func @transform_0(%arg0: i32, %arg1: i32) -> (i32, i32) {
    %c0_i32 = arith.constant 0 : i32
    %c0_i32_0 = arith.constant 0 : i32
    return %arg0, %c0_i32 : i32, i32
  }
  func.func @transform_1(%arg0: i32, %arg1: i32) -> (i32, i32, i32) {
    %c0_i32 = arith.constant 0 : i32
    %c0_i32_0 = arith.constant 0 : i32
    return %arg0, %arg1, %c0_i32 : i32, i32, i32
  }
  func.func @transform_2(%arg0: i32, %arg1: i32) -> (i32, i32) {
    %c0_i32 = arith.constant 0 : i32
    %c0_i32_0 = arith.constant 0 : i32
    return %arg0, %c0_i32 : i32, i32
  }
  func.func @transform_3(%arg0: i32, %arg1: i32) -> (i32, i32) {
    %c0_i32 = arith.constant 0 : i32
    %c0_i32_0 = arith.constant 0 : i32
    %c0_i32_1 = arith.constant 0 : i32
    return %c0_i32, %c0_i32_0 : i32, i32
  }
  func.func @transform_4(%arg0: i32, %arg1: i32) -> (i32, i32) {
    %c0_i32 = arith.constant 0 : i32
    %c0_i32_0 = arith.constant 0 : i32
    %c0_i32_1 = arith.constant 0 : i32
    return %c0_i32, %c0_i32_0 : i32, i32
  }
  func.func @transform_5(%arg0: i32, %arg1: i32) -> (i32, i32) {
    %c0_i32 = arith.constant 0 : i32
    %c0_i32_0 = arith.constant 0 : i32
    %c0_i32_1 = arith.constant 0 : i32
    return %c0_i32, %c0_i32_0 : i32, i32
  }
  func.func @transform_6(%arg0: i32, %arg1: i32) -> (i32, i32) {
    %c0_i32 = arith.constant 0 : i32
    %c0_i32_0 = arith.constant 0 : i32
    %c0_i32_1 = arith.constant 0 : i32
    return %c0_i32, %c0_i32_0 : i32, i32
  }
  func.func @transform_7(%arg0: i32, %arg1: i32) -> (i32, i32) {
    %c0_i32 = arith.constant 0 : i32
    %c0_i32_0 = arith.constant 0 : i32
    %c0_i32_1 = arith.constant 0 : i32
    return %c0_i32, %c0_i32_0 : i32, i32
  }
  func.func @transform_8(%arg0: i32, %arg1: i32) -> (i32, i32) {
    %c0_i32 = arith.constant 0 : i32
    %c0_i32_0 = arith.constant 0 : i32
    %c0_i32_1 = arith.constant 0 : i32
    return %c0_i32, %c0_i32_0 : i32, i32
  }
  func.func @transform_9(%arg0: i32, %arg1: i32) -> (i32, i32) {
    %c0_i32 = arith.constant 0 : i32
    %c0_i32_0 = arith.constant 0 : i32
    %c0_i32_1 = arith.constant 0 : i32
    return %c0_i32, %c0_i32_0 : i32, i32
  }
  func.func @transform_10(%arg0: i32, %arg1: i32) -> (i32, i32) {
    %c0_i32 = arith.constant 0 : i32
    %c0_i32_0 = arith.constant 0 : i32
    return %arg0, %c0_i32 : i32, i32
  }
}

</mosaic_0001>

<bundles_post_ra>
// kernel: tpu_custom_call.1
= control target key start
LH: loop header
LB: loop body
LE: loop exit
PB: predicated region body
PF: predicated region fallthrough
CT: control target
= control target key end

     0   :  { %s1613_s0 = inlined_call_operand.vmem [shape: f32[8,4], index: 0, kind: input, shape index: {}]   ;;  %s1614_s1 = inlined_call_operand.vmem [shape: f32[8,8,4], index: 1, kind: input, shape index: {}]   ;;  %s1615_s2 = inlined_call_operand.vmem [shape: s32[8,1], index: 2, kind: input, shape index: {}]   ;;  %s1616_s3 = inlined_call_operand.hbm [shape: f32[4,128], index: 3, kind: input, shape index: {}]   ;;  %s1617_s4 = inlined_call_operand.hbm [shape: f32[8,128], index: 4, kind: input, shape index: {}]   ;;  %s1618_s5 = inlined_call_operand.vmem [shape: f32[1,128], index: 5, kind: input, shape index: {}]   ;;  %s1619_s6 = inlined_call_operand.vmem [shape: f32[128,128], index: 6, kind: input, shape index: {}]   ;;  %s1620_s7 = inlined_call_operand.vmem [shape: f32[1,128], index: 7, kind: input, shape index: {}]   ;;  %s1621_s8 = inlined_call_operand.vmem [shape: f32[1,128], index: 8, kind: input, shape index: {}]   ;;  %s1622_s9 = inlined_call_operand.<no memory space> [shape: f32[1,1], index: 9, kind: input, shape index: {}]   ;;  %s1623_s10 = inlined_call_operand.vmem [shape: f32[8,4], index: 10, kind: output, shape index: {}]  }
   0x1   :  { %v15_v0 = vstv %s1622_s9 }
   0x2   :  { %16 = vst [vmem:[#allocation3] sm:$0x1] %v15_v0 }
   0x3   :  { %17 = vsyncpa [#allocation5], 0 }
   0x4   :  { %18 = vsyncpa [#allocation7], 0  ;;  %s1321_s15 = smov [#allocation4]   ;;  %s1322_s17 = smov [#allocation6]  }
   0x5   :  { %s31_s16 = sshll.u32 %s1321_s15, 4  ;;  %s41_s18 = sshll.u32 %s1322_s17, 4  ;;  %s32_s16 = int_to_ptr.vmem [resolvable:$true] %s31_s16  ;;  %s42_s18 = int_to_ptr.vmem [resolvable:$true] %s41_s18 }
   0x6   :  { %s1285_s19 = scalar_lea.vmem %s32_s16, 64  ;;  %p1290_p1 = scmp.lt.s32.totalorder %s32_s16, %s32_s16 }
   0x7   :  { %p1286_p0 = scmp.ne.s32.totalorder %s32_s16, %s1285_s19  ;;  %p1291_p2 = scmp.lt.s32.totalorder %s1285_s19, %s1285_s19 }
   0x9   :  { %p1292_p3 = por %p1291_p2, %p1290_p1 }
   0xb   :  { %p1293_p4 = pnand %p1292_p3, %p1286_p0 }
   0xd   :  { %1296 = shalt.err (!%p1293_p4)
}
   0xe   :  { %34 = dma.hbm_to_vmem [thread:$0]  %s1616_s3, 64, %s32_s16, [#allocation5]  }
   0xf   :  { %s1305_s9 = scalar_lea.vmem %s42_s18, 128  ;;  %p1310_p6 = scmp.lt.s32.totalorder %s42_s18, %s42_s18 }
  0x10   :  { %p1306_p5 = scmp.ne.s32.totalorder %s42_s18, %s1305_s9  ;;  %p1311_p7 = scmp.lt.s32.totalorder %s1305_s9, %s1305_s9 }
  0x12   :  { %p1312_p8 = por %p1311_p7, %p1310_p6 }
  0x14   :  { %p1313_p9 = pnand %p1312_p8, %p1306_p5 }
  0x16   :  { %1316 = shalt.err (!%p1313_p9)
}
  0x17   :  { %44 = dma.hbm_to_vmem [thread:$0]  %s1617_s4, 128, %s42_s18, [#allocation7]  }
  0x18   :  { %1317 = dma.done.wait [#allocation5], 64  }
  0x19   :  { %1318 = vsyncadd [#allocation5], 4294967232 }
  0x1a   :  { %1319 = dma.done.wait [#allocation7], 128  }
  0x1b   :  { %1320 = vsyncadd [#allocation7], 4294967168  ;;  %v81_v1 = vlaneseq  ;;  %v1323_v2 = vmov 1966171168   ;;  %vm65_vm0 = vcmask 31744   ;;  %v1324_v5 = vmov 0.0  }
  0x1c   :  { %v79_v3 = vunpack.c.l.s4 %v1323_v2  ;;  %66 = vst.msk [vmem:[#allocation2] sm:$0xff] %vm65_vm0, %v1324_v5  ;;  %1107 = vmatprep.subr.mxu0 %v1324_v5  ;;  %vm1325_vm1 = vmmov 0   ;;  %v67_v8 = vld [vmem:[%s1613_s0] sm:$0xff]  ;;  %vm218_vm2 = vcmask 1043456   ;;  %v215_v15 = vld [vmem:[#allocation4] sm:$0xf] }
  0x1d   :  { %v1392_v4 = vshrl.u32 %v81_v1, 7  ;;  %1109 = vmatprep.mubr.msk.f32.mxu0 %vm1325_vm1, %v1324_v5  ;;  %v77_v11 = vcombine.high %v67_v8, %v67_v8  ;;  %v292_v16 = vld [vmem:[#allocation6] sm:$0xff]  ;;  %v1410_v17 = vld [vmem:[%s1614_s1] sm:$0xff]  ;;  %1108 = vmatpush3.msk.msra.mxu0 %vm218_vm2, %v215_v15  ;;  %v1432_v29 = vld [vmem:[%s1614_s1 + $0x18] sm:$0xff]  ;;  %s1326_s11 = smov 4   ;;  %vm300_vm3 = vcmask 64512  }
  0x1e   :  { %v80_v6 = vunpack.c.0.s8 %v79_v3  ;;  %1112 = vmatprep.subr.mxu1 %v292_v16  ;;  %1110 = vmatmul.mubr.msk.f32.vlgmr.msra.gmra.mxu0 %vm65_vm0, %v67_v8  ;;  %v1419_v22 = vld [vmem:[%s1614_s1 + $0x10] sm:$0xff]  ;;  %v1424_v23 = vld [vmem:[%s1614_s1 + $0x8] sm:$0xff]  ;;  %v1442_v36 = vld [vmem:[%s1614_s1 + $0x20] sm:$0xff]  ;;  %vm1014_vm12 = vcmask 1041409   ;;  %vm1016_vm13 = vcmask 1042434   ;;  %vm1018_vm14 = vcmask 1043459  }
  0x1f   :  { %v1403_v10 = vsub.s32 0, %v1392_v4  ;;  %1113 = vmatpush3.msra.mxu1 %v292_v16  ;;  %v1449_v40 = vld [vmem:[%s1614_s1 + $0x28] sm:$0xff]  ;;  %v1456_v43 = vld [vmem:[%s1614_s1 + $0x30] sm:$0xff]  ;;  %v1463_v46 = vld [vmem:[%s1614_s1 + $0x38] sm:$0xff]  ;;  %vm1020_vm15 = vcmask 1044484   ;;  %vm1022_vm1 = vcmask 1045509  }
  0x20   :  { %v1396_v7 = vsub.s32 %v80_v6, %v1392_v4  ;;  %v591_v3 = vld [vmem:[%s1619_s6 + $0x78] sm:$0xff]  ;;  %v590_v5 = vld [vmem:[%s1619_s6 + $0x70] sm:$0xff]  ;;  %v589_v6 = vld [vmem:[%s1619_s6 + $0x68] sm:$0xff]  ;;  %vm1024_vm2 = vcmask 1046534  }
  0x21   :  { %1126 = vmatprep.subr.mxu0 %v591_v3  ;;  %1170 = vmatprep.subr.mxu1 %v591_v3  ;;  %v582_v15 = vld [vmem:[%s1619_s6 + $0x30] sm:$0xff]  ;;  %v581_v16 = vld [vmem:[%s1619_s6 + $0x28] sm:$0xff] }
  0x22   :  { %v84_v9 = vrot.slane %v67_v8, %v1396_v7  ;;  %v91_v14 = vrot.slane %v77_v11, %v1396_v7  ;;  %1127 = vmatpush3.msra.mxu0 %v591_v3  ;;  %v588_v8 = vld [vmem:[%s1619_s6 + $0x60] sm:$0xff]  ;;  %v586_v11 = vld [vmem:[%s1619_s6 + $0x50] sm:$0xff] }
  0x23   :  { %1128 = vmatprep.subr.mxu0 %v590_v5 }
  0x24   :  { %v100_v12 = vrot.slane %v84_v9, %v1396_v7  ;;  %v92_v13 = vcombine.high %v84_v9, %v84_v9  ;;  %v107_v21 = vrot.slane %v91_v14, %v1396_v7  ;;  %v93_v24 = vcombine.high %v91_v14, %v91_v14  ;;  %1129 = vmatpush3.msra.mxu0 %v590_v5  ;;  %v587_v9 = vld [vmem:[%s1619_s6 + $0x58] sm:$0xff] }
  0x25   :  { %1130 = vmatprep.subr.mxu0 %v589_v6  ;;  %v583_v14 = vld [vmem:[%s1619_s6 + $0x38] sm:$0xff] }
  0x26   :  { %v129_v18 = vrot.slane %v100_v12, %v1403_v10  ;;  %v122_v19 = vcombine.high %v100_v12, %v100_v12  ;;  %v114_v20 = vrot.slane %v92_v13, %v1396_v7  ;;  %v145_v30 = vrot.slane %v107_v21, %v1403_v10  ;;  %1131 = vmatpush3.msra.mxu0 %v589_v6  ;;  %v585_v12 = vld [vmem:[%s1619_s6 + $0x48] sm:$0xff]  ;;  %v584_v13 = vld [vmem:[%s1619_s6 + $0x40] sm:$0xff] }
  0x27   :  { %v121_v31 = vrot.slane %v93_v24, %v1396_v7  ;;  %v123_v35 = vcombine.high %v107_v21, %v107_v21  ;;  %1132 = vmatprep.subr.mxu0 %v588_v8  ;;  %v577_v21 = vld [vmem:[%s1619_s6 + $0x8] sm:$0xff]  ;;  %v576_v24 = vld [vmem:[%s1619_s6] sm:$0xff] }
  0x28   :  { %v166_v25 = vmul.f32 %v129_v18, %v1410_v17  ;;  %v137_v26 = vrot.slane %v122_v19, %v1403_v10  ;;  %v133_v27 = vrot.slane %v114_v20, %v1403_v10  ;;  %v124_v28 = vcombine.high %v114_v20, %v114_v20  ;;  %1133 = vmatpush3.msra.mxu0 %v588_v8  ;;  %v580_v18 = vld [vmem:[%s1619_s6 + $0x20] sm:$0xff]  ;;  %v579_v19 = vld [vmem:[%s1619_s6 + $0x18] sm:$0xff]  ;;  %v578_v20 = vld [vmem:[%s1619_s6 + $0x10] sm:$0xff] }
  0x29   :  { %v149_v38 = vrot.slane %v121_v31, %v1403_v10  ;;  %v125_v39 = vcombine.high %v121_v31, %v121_v31  ;;  %v170_v41 = vmul.f32 %v145_v30, %v1442_v36  ;;  %v153_v42 = vrot.slane %v123_v35, %v1403_v10  ;;  %1134 = vmatprep.subr.mxu0 %v587_v9 }
  0x2a   :  { %182 = vrot.lane.b32.xlu0 %v166_v25, %s1326_s11  ;;  %v168_v32 = vmul.f32 %v137_v26, %v1419_v22  ;;  %v167_v33 = vmul.f32 %v133_v27, %v1424_v23  ;;  %v141_v34 = vrot.slane %v124_v28, %v1403_v10  ;;  %1135 = vmatpush3.msra.mxu0 %v587_v9 }
  0x2b   :  { %v171_v44 = vmul.f32 %v149_v38, %v1449_v40  ;;  %v157_v45 = vrot.slane %v125_v39, %v1403_v10  ;;  %v172_v47 = vmul.f32 %v153_v42, %v1456_v43  ;;  %1136 = vmatprep.subr.mxu0 %v586_v11 }
  0x2c   :  { %186 = vrot.lane.b32.xlu1 %v168_v32, %s1326_s11  ;;  %v169_v37 = vmul.f32 %v141_v34, %v1432_v29  ;;  %1137 = vmatpush3.msra.mxu0 %v586_v11  ;;  %v1044_v32 = vld [vmem:[%s1618_s5] ss:$0 sm:$0xff] }
  0x2d   :  { %v173_v48 = vmul.f32 %v157_v45, %v1463_v46  ;;  %1138 = vmatprep.subr.mxu0 %v585_v12 }
  0x2e   :  { %184 = vrot.lane.b32.xlu0 %v167_v33, %s1326_s11  ;;  %1139 = vmatpush3.msra.mxu0 %v585_v12 }
  0x2f   :  { %1140 = vmatprep.subr.mxu0 %v584_v13 }
  0x30   :  { %188 = vrot.lane.b32.xlu1 %v169_v37, %s1326_s11  ;;  %1141 = vmatpush3.msra.mxu0 %v584_v13 }
  0x31   :  { %1142 = vmatprep.subr.mxu0 %v583_v14 }
  0x32   :  { %190 = vrot.lane.b32.xlu0 %v170_v41, %s1326_s11  ;;  %1143 = vmatpush3.msra.mxu0 %v583_v14 }
  0x33   :  { %1144 = vmatprep.subr.mxu0 %v582_v15 }
  0x34   :  { %192 = vrot.lane.b32.xlu1 %v171_v44, %s1326_s11  ;;  %1145 = vmatpush3.msra.mxu0 %v582_v15 }
  0x35   :  { %1146 = vmatprep.subr.mxu0 %v581_v16 }
  0x36   :  { %194 = vrot.lane.b32.xlu0 %v172_v47, %s1326_s11  ;;  %1147 = vmatpush3.msra.mxu0 %v581_v16 }
  0x37   :  { %1148 = vmatprep.subr.mxu0 %v580_v18 }
  0x38   :  { %196 = vrot.lane.b32.xlu1 %v173_v48, %s1326_s11  ;;  %1149 = vmatpush3.msra.mxu0 %v580_v18 }
  0x39   :  { %1150 = vmatprep.subr.mxu0 %v579_v19 }
  0x3a   :  { %1151 = vmatpush3.msra.mxu0 %v579_v19 }
  0x3b   :  { %1152 = vmatprep.subr.mxu0 %v578_v20 }
  0x3c   :  { %1153 = vmatpush3.msra.mxu0 %v578_v20 }
  0x3d   :  { %1154 = vmatprep.subr.mxu0 %v577_v21 }
  0x3e   :  { %1155 = vmatpush3.msra.mxu0 %v577_v21 }
  0x3f   :  { %1156 = vmatprep.subr.mxu0 %v576_v24 }
  0x40   :  { %1157 = vmatpush3.msra.mxu0 %v576_v24 }
  0x9c   :  { %v183_v49 = vpop.permute.xlu0 %182 }
  0x9d   :  { %v207_v50 = vsel %vm65_vm0, %v1410_v17, %v183_v49 }
  0x9e   :  { %1114 = vmatprep.mubr.msk.f32.mxu1 %vm300_vm3, %v207_v50  ;;  %v187_v51 = vpop.permute.xlu1 %186 }
  0x9f   :  { %v209_v52 = vsel %vm65_vm0, %v1419_v22, %v187_v51 }
  0xa0   :  { %v185_v53 = vpop.permute.xlu0 %184 }
  0xa1   :  { %v208_v54 = vsel %vm65_vm0, %v1424_v23, %v185_v53 }
  0xa2   :  { %1115 = vmatmul.mubr.msk.f32.vlgmr.msra.gmra.mxu1 %vm300_vm3, %v208_v54  ;;  %v189_v55 = vpop.permute.xlu1 %188 }
  0xa3   :  { %1117 = vmatprep.mubr.msk.f32.mxu1 %vm300_vm3, %v209_v52  ;;  %v210_v56 = vsel %vm65_vm0, %v1432_v29, %v189_v55  ;;  %1186 = vmatpush3.msra.mxu1 %v591_v3 }
  0xa4   :  { %v191_v57 = vpop.permute.xlu0 %190  ;;  %1171 = vmatprep.subr.mxu1 %v590_v5 }
  0xa5   :  { %v211_v58 = vsel %vm65_vm0, %v1442_v36, %v191_v57  ;;  %1187 = vmatpush3.msra.mxu1 %v590_v5 }
  0xa6   :  { %1118 = vmatmul.mubr.msk.f32.gmra.mxu1 %vm300_vm3, %v210_v56  ;;  %v193_v59 = vpop.permute.xlu1 %192  ;;  %1172 = vmatprep.subr.mxu1 %v589_v6 }
  0xa7   :  { %v212_v60 = vsel %vm65_vm0, %v1449_v40, %v193_v59  ;;  %1120 = vmatprep.mubr.msk.f32.mxu1 %vm300_vm3, %v211_v58  ;;  %1188 = vmatpush3.msra.mxu1 %v589_v6 }
  0xa8   :  { %v195_v61 = vpop.permute.xlu0 %194  ;;  %1173 = vmatprep.subr.mxu1 %v588_v8 }
  0xa9   :  { %v213_v62 = vsel %vm65_vm0, %v1456_v43, %v195_v61  ;;  %1189 = vmatpush3.msra.mxu1 %v588_v8 }
  0xaa   :  { %1121 = vmatmul.mubr.msk.f32.gmra.mxu1 %vm300_vm3, %v212_v60  ;;  %v197_v63 = vpop.permute.xlu1 %196  ;;  %1174 = vmatprep.subr.mxu1 %v587_v9 }
  0xab   :  { %v214_v0 = vsel %vm65_vm0, %v1463_v46, %v197_v63  ;;  %1123 = vmatprep.mubr.msk.f32.mxu1 %vm300_vm3, %v213_v62  ;;  %1190 = vmatpush3.msra.mxu1 %v587_v9 }
  0xac   :  { %1175 = vmatprep.subr.mxu1 %v586_v11 }
  0xad   :  { %1191 = vmatpush3.msra.mxu1 %v586_v11 }
  0xae   :  { %1124 = vmatmul.mubr.msk.f32.gmra.mxu1 %vm300_vm3, %v214_v0  ;;  %1176 = vmatprep.subr.mxu1 %v585_v12  ;;  %vm1026_vm3 = vcmask 1047559  }
  0xaf   :  { %1192 = vmatpush3.msra.mxu1 %v585_v12 }
  0xb0   :  { %1177 = vmatprep.subr.mxu1 %v584_v13 }
  0xb1   :  { %1193 = vmatpush3.msra.mxu1 %v584_v13 }
  0xb2   :  { %1178 = vmatprep.subr.mxu1 %v583_v14 }
  0xb3   :  { %1194 = vmatpush3.msra.mxu1 %v583_v14 }
  0xb4   :  { %1179 = vmatprep.subr.mxu1 %v582_v15 }
  0xb5   :  { %1195 = vmatpush3.msra.mxu1 %v582_v15 }
  0xb6   :  { %1180 = vmatprep.subr.mxu1 %v581_v16 }
  0xb7   :  { %1196 = vmatpush3.msra.mxu1 %v581_v16 }
  0xb8   :  { %1181 = vmatprep.subr.mxu1 %v580_v18 }
  0xb9   :  { %1197 = vmatpush3.msra.mxu1 %v580_v18 }
  0xba   :  { %1182 = vmatprep.subr.mxu1 %v579_v19 }
  0xbb   :  { %1198 = vmatpush3.msra.mxu1 %v579_v19 }
  0xbc   :  { %1183 = vmatprep.subr.mxu1 %v578_v20 }
  0xbd   :  { %1199 = vmatpush3.msra.mxu1 %v578_v20 }
  0xbe   :  { %1184 = vmatprep.subr.mxu1 %v577_v21 }
  0xbf   :  { %1200 = vmatpush3.msra.mxu1 %v577_v21 }
  0xc0   :  { %1185 = vmatprep.subr.mxu1 %v576_v24 }
  0xc1   :  { %1201 = vmatpush3.msra.mxu1 %v576_v24 }
  0xde   :  { %v1491_v1 = vpop.f32.mrf.mxu0 }
  0xdf   :  { %v438_v25 = vrot.slane %v1491_v1, %v1396_v7  ;;  %v431_v27 = vcombine.high %v1491_v1, %v1491_v1 }
  0xe0   :  { %v1111_v2 = vpop.f32.mrf.mxu0 }
  0xe1   :  { %v446_v26 = vcombine.high %v438_v25, %v438_v25  ;;  %v445_v30 = vrot.slane %v431_v27, %v1396_v7  ;;  %v454_v31 = vrot.slane %v438_v25, %v1396_v7 }
  0xe3   :  { %v468_v28 = vrot.slane %v446_v26, %v1396_v7  ;;  %v447_v35 = vcombine.high %v445_v30, %v445_v30  ;;  %v483_v39 = vrot.slane %v454_v31, %v1403_v10  ;;  %v476_v41 = vcombine.high %v454_v31, %v454_v31 }
  0xe4   :  { %v461_v53 = vrot.slane %v445_v30, %v1396_v7 }
  0xe5   :  { %v487_v33 = vrot.slane %v468_v28, %v1403_v10  ;;  %v478_v34 = vcombine.high %v468_v28, %v468_v28  ;;  %v475_v49 = vrot.slane %v447_v35, %v1396_v7  ;;  %v491_v55 = vrot.slane %v476_v41, %v1403_v10 }
  0xe6   :  { %v499_v2 = vrot.slane %v461_v53, %v1403_v10  ;;  %v477_v3 = vcombine.high %v461_v53, %v461_v53 }
  0xe7   :  { %v495_v47 = vrot.slane %v478_v34, %v1403_v10  ;;  %v503_v60 = vrot.slane %v475_v49, %v1403_v10  ;;  %v479_v61 = vcombine.high %v475_v49, %v475_v49 }
  0xe8   :  { %v507_v16 = vrot.slane %v477_v3, %v1403_v10 }
  0xe9   :  { %v511_v11 = vrot.slane %v479_v61, %v1403_v10 }
 0x162   :  { %v1116_v37 = vpop.f32.mrf.mxu1 }
 0x163   :  { %v397_v38 = vadd.f32 %v1116_v37, %v1044_v32 }
 0x164   :  { %v391_v42 = vpop.f32.mrf.mxu1 }
 0x165   :  { %v521_v44 = vadd.f32 %v487_v33, %v397_v38  ;;  %v392_v45 = vadd.f32 %v1044_v32, %v391_v42 }
 0x166   :  { %v1119_v48 = vpop.f32.mrf.mxu1 }
 0x167   :  { %v1054_v50 = vmul.f32 -1.442695, %v521_v44  ;;  %v520_v51 = vadd.f32 %v483_v39, %v392_v45  ;;  %v407_v52 = vadd.f32 %v1119_v48, %v1044_v32 }
 0x168   :  { %v401_v54 = vpop.f32.mrf.mxu1 }
 0x169   :  { %1213 = vpow2.f32 %v1054_v50  ;;  %v1053_v56 = vmul.f32 -1.442695, %v520_v51  ;;  %v523_v57 = vadd.f32 %v495_v47, %v407_v52  ;;  %v402_v58 = vadd.f32 %v1044_v32, %v401_v54 }
 0x16a   :  { %v1122_v59 = vpop.f32.mrf.mxu1 }
 0x16b   :  { %1215 = vpow2.f32 %v1053_v56  ;;  %v1056_v62 = vmul.f32 -1.442695, %v523_v57  ;;  %v522_v63 = vadd.f32 %v491_v55, %v402_v58  ;;  %v417_v0 = vadd.f32 %v1122_v59, %v1044_v32  ;;  %v1061_v55 = vld [vmem:[%s1620_s7] ss:$0 sm:$0xff] }
 0x16c   :  { %v411_v1 = vpop.f32.mrf.mxu1 }
 0x16d   :  { %1217 = vpow2.f32 %v1056_v62  ;;  %v1055_v5 = vmul.f32 -1.442695, %v522_v63  ;;  %v525_v6 = vadd.f32 %v503_v60, %v417_v0  ;;  %v412_v8 = vadd.f32 %v1044_v32, %v411_v1 }
 0x16e   :  { %v1125_v9 = vpop.f32.mrf.mxu1 }
 0x16f   :  { %1219 = vpow2.f32 %v1055_v5  ;;  %v1058_v12 = vmul.f32 -1.442695, %v525_v6  ;;  %v524_v13 = vadd.f32 %v499_v2, %v412_v8  ;;  %v427_v14 = vadd.f32 %v1125_v9, %v1044_v32 }
 0x170   :  { %v421_v15 = vpop.f32.mrf.mxu1 }
 0x171   :  { %1221 = vpow2.f32 %v1058_v12  ;;  %v1057_v18 = vmul.f32 -1.442695, %v524_v13  ;;  %v527_v19 = vadd.f32 %v511_v11, %v427_v14  ;;  %v422_v20 = vadd.f32 %v1044_v32, %v421_v15 }
 0x173   :  { %1223 = vpow2.f32 %v1057_v18  ;;  %v1060_v21 = vmul.f32 -1.442695, %v527_v19  ;;  %v526_v24 = vadd.f32 %v507_v16, %v422_v20 }
 0x175   :  { %1225 = vpow2.f32 %v1060_v21  ;;  %v1059_v25 = vmul.f32 -1.442695, %v526_v24 }
 0x176   :  { %v1214_v26 = vpop.eup %1213 }
 0x177   :  { %1227 = vpow2.f32 %v1059_v25  ;;  %v553_v28 = vadd.f32 1.0, %v1214_v26 }
 0x178   :  { %v1216_v27 = vpop.eup %1215 }
 0x179   :  { %v552_v30 = vadd.f32 1.0, %v1216_v27 }
 0x17a   :  { %v1218_v31 = vpop.eup %1217 }
 0x17b   :  { %1229 = vrcp.f32 %v552_v30  ;;  %v555_v34 = vadd.f32 1.0, %v1218_v31 }
 0x17c   :  { %v1220_v33 = vpop.eup %1219  ;;  %1231 = vrcp.f32 %v553_v28 }
 0x17d   :  { %v554_v35 = vadd.f32 1.0, %v1220_v33 }
 0x17e   :  { %v1222_v37 = vpop.eup %1221 }
 0x17f   :  { %1233 = vrcp.f32 %v554_v35  ;;  %v557_v32 = vadd.f32 1.0, %v1222_v37 }
 0x180   :  { %v1224_v38 = vpop.eup %1223  ;;  %1235 = vrcp.f32 %v555_v34 }
 0x181   :  { %v556_v39 = vadd.f32 1.0, %v1224_v38 }
 0x182   :  { %v1226_v41 = vpop.eup %1225 }
 0x183   :  { %1237 = vrcp.f32 %v556_v39  ;;  %v559_v44 = vadd.f32 1.0, %v1226_v41 }
 0x184   :  { %v1228_v42 = vpop.eup %1227  ;;  %1239 = vrcp.f32 %v557_v32  ;;  %v1070_v32 = vld [vmem:[%s1621_s8] ss:$0 sm:$0xff] }
 0x185   :  { %v558_v45 = vadd.f32 1.0, %v1228_v42 }
 0x187   :  { %1241 = vrcp.f32 %v558_v45 }
 0x188   :  { %v1230_v47 = vpop.eup %1229  ;;  %1243 = vrcp.f32 %v559_v44 }
 0x189   :  { %v1232_v48 = vpop.eup %1231  ;;  %1158 = vmatprep.mubr.f32.mxu0 %v1230_v47 }
 0x18a   :  { %1159 = vmatmul.mubr.f32.vlgmr.msra.gmra.mxu0 %v1232_v48 }
 0x18c   :  { %v1234_v49 = vpop.eup %1233 }
 0x18d   :  { %v1236_v50 = vpop.eup %1235  ;;  %1161 = vmatprep.mubr.f32.mxu0 %v1234_v49 }
 0x18e   :  { %1162 = vmatmul.mubr.f32.gmra.mxu0 %v1236_v50 }
 0x190   :  { %v1238_v51 = vpop.eup %1237 }
 0x191   :  { %v1240_v52 = vpop.eup %1239  ;;  %1164 = vmatprep.mubr.f32.mxu1 %v1238_v51 }
 0x192   :  { %1165 = vmatmul.mubr.f32.vlgmr.msra.gmra.mxu1 %v1240_v52 }
 0x194   :  { %v1242_v53 = vpop.eup %1241 }
 0x195   :  { %v1244_v54 = vpop.eup %1243  ;;  %1167 = vmatprep.mubr.f32.mxu1 %v1242_v53 }
 0x196   :  { %1168 = vmatmul.mubr.f32.gmra.mxu1 %v1244_v54 }
 0x24a   :  { %v1160_v56 = vpop.f32.mrf.mxu0 }
 0x24b   :  { %v671_v57 = vadd.f32 %v1160_v56, %v1061_v55 }
 0x24c   :  { %v665_v58 = vpop.f32.mrf.mxu0 }
 0x24d   :  { %v1063_v59 = vmul.f32 -1.442695, %v671_v57  ;;  %v666_v60 = vadd.f32 %v1061_v55, %v665_v58  ;;  %v1327_v58 = vmov 0  }
 0x24e   :  { %v1163_v61 = vpop.f32.mrf.mxu0  ;;  %1210 = vset.pattern.permute.xlu0 %v1327_v58  ;;  %1209 = vset.pattern.permute.xlu1 %v1327_v58 }
 0x24f   :  { %1245 = vpow2.f32 %v1063_v59  ;;  %v1062_v62 = vmul.f32 -1.442695, %v666_v60  ;;  %v681_v63 = vadd.f32 %v1163_v61, %v1061_v55  ;;  %v803_v61 = vld [vmem:[%s1615_s2] sm:$0xff] }
 0x250   :  { %v675_v0 = vpop.f32.mrf.mxu0 }
 0x251   :  { %1247 = vpow2.f32 %v1062_v62  ;;  %v1065_v1 = vmul.f32 -1.442695, %v681_v63  ;;  %v676_v2 = vadd.f32 %v1061_v55, %v675_v0  ;;  %v811_v62 = vrot.slane %v803_v61, %v1396_v7 }
 0x252   :  { %v1166_v3 = vpop.f32.mrf.mxu1 }
 0x253   :  { %1249 = vpow2.f32 %v1065_v1  ;;  %v1064_v5 = vmul.f32 -1.442695, %v676_v2  ;;  %v691_v6 = vadd.f32 %v1166_v3, %v1061_v55  ;;  %v819_v63 = vcombine.high %v811_v62, %v811_v62 }
 0x254   :  { %v685_v8 = vpop.f32.mrf.mxu1  ;;  %v827_v1 = vrot.slane %v811_v62, %v1396_v7  ;;  %v804_v3 = vcombine.high %v803_v61, %v803_v61 }
 0x255   :  { %1251 = vpow2.f32 %v1064_v5  ;;  %v1067_v9 = vmul.f32 -1.442695, %v691_v6  ;;  %v686_v11 = vadd.f32 %v1061_v55, %v685_v8  ;;  %v841_v0 = vrot.slane %v819_v63, %v1396_v7  ;;  %v1071_v5 = vld [vmem:[#allocation3] ss:$0 sm:$0xff] }
 0x256   :  { %v1169_v12 = vpop.f32.mrf.mxu1  ;;  %v856_v6 = vrot.slane %v827_v1, %v1403_v10 }
 0x257   :  { %1253 = vpow2.f32 %v1067_v9  ;;  %v1066_v13 = vmul.f32 -1.442695, %v686_v11  ;;  %v701_v14 = vadd.f32 %v1169_v12, %v1061_v55  ;;  %v860_v2 = vrot.slane %v841_v0, %v1403_v10 }
 0x258   :  { %v695_v15 = vpop.f32.mrf.mxu1  ;;  %v851_v8 = vcombine.high %v841_v0, %v841_v0  ;;  %v818_v11 = vrot.slane %v804_v3, %v1396_v7  ;;  %vm885_vm5 = vcmp.lt.s32.totalorder %v1392_v4, %v856_v6 }
 0x259   :  { %1255 = vpow2.f32 %v1066_v13  ;;  %v1069_v16 = vmul.f32 -1.442695, %v701_v14  ;;  %v696_v18 = vadd.f32 %v1061_v55, %v695_v15  ;;  %vm886_vm4 = vcmp.lt.s32.totalorder %v1392_v4, %v860_v2 }
 0x25a   :  { %v868_v14 = vrot.slane %v851_v8, %v1403_v10  ;;  %v849_v15 = vcombine.high %v827_v1, %v827_v1 }
 0x25b   :  { %1257 = vpow2.f32 %v1069_v16  ;;  %v1068_v19 = vmul.f32 -1.442695, %v696_v18  ;;  %v820_v16 = vcombine.high %v818_v11, %v818_v11 }
 0x25c   :  { %v1246_v20 = vpop.eup %1245  ;;  %vm888_vm6 = vcmp.lt.s32.totalorder %v1392_v4, %v868_v14 }
 0x25d   :  { %v729_v21 = vadd.f32 1.0, %v1246_v20  ;;  %1259 = vpow2.f32 %v1068_v19 }
 0x25e   :  { %v1248_v24 = vpop.eup %1247 }
 0x25f   :  { %1261 = vrcp.f32 %v729_v21  ;;  %v728_v25 = vadd.f32 1.0, %v1248_v24  ;;  %v864_v24 = vrot.slane %v849_v15, %v1403_v10 }
 0x260   :  { %v1250_v26 = vpop.eup %1249 }
 0x261   :  { %1263 = vrcp.f32 %v728_v25  ;;  %v731_v27 = vadd.f32 1.0, %v1250_v26  ;;  %v848_v25 = vrot.slane %v820_v16, %v1396_v7  ;;  %vm887_vm7 = vcmp.lt.s32.totalorder %v1392_v4, %v864_v24 }
 0x262   :  { %v1252_v28 = vpop.eup %1251 }
 0x263   :  { %1265 = vrcp.f32 %v731_v27  ;;  %v730_v30 = vadd.f32 1.0, %v1252_v28 }
 0x264   :  { %v1254_v31 = vpop.eup %1253 }
 0x265   :  { %1267 = vrcp.f32 %v730_v30  ;;  %v733_v34 = vadd.f32 1.0, %v1254_v31  ;;  %v876_v30 = vrot.slane %v848_v25, %v1403_v10  ;;  %v834_v31 = vrot.slane %v818_v11, %v1396_v7 }
 0x266   :  { %v1256_v33 = vpop.eup %1255  ;;  %v852_v7 = vcombine.high %v848_v25, %v848_v25 }
 0x267   :  { %v732_v35 = vadd.f32 1.0, %v1256_v33  ;;  %vm890_vm8 = vcmp.lt.s32.totalorder %v1392_v4, %v876_v30 }
 0x268   :  { %v1258_v37 = vpop.eup %1257 }
 0x269   :  { %1269 = vrcp.f32 %v732_v35  ;;  %v735_v39 = vadd.f32 1.0, %v1258_v37 }
 0x26a   :  { %v1260_v38 = vpop.eup %1259  ;;  %1271 = vrcp.f32 %v733_v34 }
 0x26b   :  { %v734_v41 = vadd.f32 1.0, %v1260_v38  ;;  %v872_v38 = vrot.slane %v834_v31, %v1403_v10 }
 0x26c   :  { %v1262_v42 = vpop.eup %1261 }
 0x26d   :  { %1273 = vrcp.f32 %v734_v41  ;;  %v760_v44 = vmul.f32 %v1262_v42, %v1070_v32  ;;  %vm889_vm9 = vcmp.lt.s32.totalorder %v1392_v4, %v872_v38 }
 0x26e   :  { %v1264_v45 = vpop.eup %1263  ;;  %1275 = vrcp.f32 %v735_v39 }
 0x26f   :  { %769 = vadd.xlane.f32.xlu1 %v760_v44  ;;  %v759_v47 = vmul.f32 %v1264_v45, %v1070_v32 }
 0x270   :  { %v1266_v48 = vpop.eup %1265 }
 0x271   :  { %767 = vadd.xlane.f32.xlu0 %v759_v47  ;;  %v762_v49 = vmul.f32 %v1266_v48, %v1070_v32 }
 0x272   :  { %v1268_v50 = vpop.eup %1267 }
 0x273   :  { %v761_v52 = vmul.f32 %v1268_v50, %v1070_v32  ;;  %v884_v50 = vrot.slane %v852_v7, %v1403_v10 }
 0x275   :  { %773 = vadd.xlane.f32.xlu0 %v762_v49  ;;  %vm892_vm11 = vcmp.lt.s32.totalorder %v1392_v4, %v884_v50 }
 0x276   :  { %v1270_v51 = vpop.eup %1269 }
 0x277   :  { %v763_v53 = vmul.f32 %v1270_v51, %v1070_v32  ;;  %v1272_v54 = vpop.eup %1271 }
 0x278   :  { %v764_v56 = vmul.f32 %v1272_v54, %v1070_v32 }
 0x279   :  { %771 = vadd.xlane.f32.xlu0 %v761_v52  ;;  %775 = vadd.xlane.f32.xlu1 %v763_v53 }
 0x27a   :  { %v1274_v55 = vpop.eup %1273 }
 0x27b   :  { %v765_v57 = vmul.f32 %v1274_v55, %v1070_v32  ;;  %v1276_v59 = vpop.eup %1275 }
 0x27c   :  { %v766_v60 = vmul.f32 %v1276_v59, %v1070_v32  ;;  %v850_v32 = vcombine.high %v834_v31, %v834_v31 }
 0x27d   :  { %777 = vadd.xlane.f32.xlu0 %v764_v56  ;;  %779 = vadd.xlane.f32.xlu1 %v765_v57 }
 0x27e   :  { %v880_v45 = vrot.slane %v850_v32, %v1403_v10 }
 0x280   :  { %vm891_vm10 = vcmp.lt.s32.totalorder %v1392_v4, %v880_v45 }
 0x281   :  { %781 = vadd.xlane.f32.xlu0 %v766_v60 }
 0x2f8   :  { %v770_v9 = vpop.xlane.xlu1 %769 }
 0x2f9   :  { %v791_v12 = vadd.f32 %v1071_v5, %v770_v9 }
 0x2fa   :  { %v768_v13 = vpop.xlane.xlu0 %767 }
 0x2fb   :  { %v790_v18 = vadd.f32 %v1071_v5, %v768_v13  ;;  %v894_v19 = vsel %vm886_vm4, %v791_v12, 0.0 }
 0x2fc   :  { %909 = vperm.xlu0 %1210, %v894_v19  }
 0x2fd   :  { %v893_v20 = vsel %vm885_vm5, %v790_v18, 0.0 }
 0x2fe   :  { %v774_v21 = vpop.xlane.xlu0 %773  ;;  %904 = vperm.xlu1 %1209, %v893_v20  }
 0x2ff   :  { %v793_v26 = vadd.f32 %v1071_v5, %v774_v21 }
 0x301   :  { %v896_v27 = vsel %vm888_vm6, %v793_v26, 0.0 }
 0x302   :  { %v772_v28 = vpop.xlane.xlu0 %771  ;;  %919 = vperm.xlu1 %1209, %v896_v27   ;;  %v776_v34 = vpop.xlane.xlu1 %775 }
 0x303   :  { %v792_v33 = vadd.f32 %v1071_v5, %v772_v28  ;;  %v794_v41 = vadd.f32 %v1071_v5, %v776_v34 }
 0x305   :  { %v895_v35 = vsel %vm887_vm7, %v792_v33, 0.0  ;;  %v897_v48 = vsel %vm889_vm9, %v794_v41, 0.0 }
 0x306   :  { %v778_v37 = vpop.xlane.xlu0 %777  ;;  %914 = vperm.xlu1 %1209, %v895_v35   ;;  %v780_v44 = vpop.xlane.xlu1 %779 }
 0x307   :  { %v795_v39 = vadd.f32 %v1071_v5, %v778_v37  ;;  %v796_v47 = vadd.f32 %v1071_v5, %v780_v44 }
 0x309   :  { %v898_v42 = vsel %vm890_vm8, %v795_v39, 0.0  ;;  %v899_v52 = vsel %vm891_vm10, %v796_v47, 0.0 }
 0x30a   :  { %929 = vperm.xlu1 %1209, %v898_v42   ;;  %v782_v49 = vpop.xlane.xlu0 %781 }
 0x30b   :  { %v797_v51 = vadd.f32 %v1071_v5, %v782_v49 }
 0x30d   :  { %v900_v53 = vsel %vm892_vm11, %v797_v51, 0.0 }
 0x30e   :  { %924 = vperm.xlu1 %1209, %v897_v48  }
 0x312   :  { %934 = vperm.xlu1 %1209, %v899_v52  }
 0x316   :  { %939 = vperm.xlu1 %1209, %v900_v53  }
 0x377   :  { %v910_v54 = vpop.permute.xlu0 %909 }
 0x378   :  { %v943_v55 = vmul.f32 %v910_v54, %v1424_v23 }
 0x379   :  { %v905_v56 = vpop.permute.xlu1 %904 }
 0x37a   :  { %v942_v57 = vmul.f32 %v905_v56, %v1410_v17  ;;  %v957_v59 = vsel %vm65_vm0, %v943_v55, 0.0 }
 0x37b   :  { %v958_v62 = vrot.slane %v957_v59, 4 }
 0x37c   :  { %v950_v58 = vsel %vm65_vm0, %v942_v57, 0.0 }
 0x37d   :  { %v920_v60 = vpop.permute.xlu1 %919  ;;  %v951_v61 = vrot.slane %v950_v58, 4  ;;  %v959_v2 = vadd.f32 %v958_v62, %v957_v59 }
 0x37e   :  { %v945_v10 = vmul.f32 %v920_v60, %v1432_v29 }
 0x37f   :  { %v952_v1 = vadd.f32 %v951_v61, %v950_v58  ;;  %v960_v11 = vrot.slane %v959_v2, 2 }
 0x380   :  { %v971_v63 = vsel %vm65_vm0, %v945_v10, 0.0 }
 0x381   :  { %v915_v4 = vpop.permute.xlu1 %914  ;;  %v972_v23 = vrot.slane %v971_v63, 4  ;;  %v953_v8 = vrot.slane %v952_v1, 2  ;;  %v961_v18 = vadd.f32 %v960_v11, %v959_v2 }
 0x382   :  { %v944_v0 = vmul.f32 %v915_v4, %v1419_v22 }
 0x383   :  { %v973_v29 = vadd.f32 %v972_v23, %v971_v63  ;;  %v954_v16 = vadd.f32 %v953_v8, %v952_v1  ;;  %v962_v30 = vrot.slane %v961_v18, 1 }
 0x384   :  { %v964_v3 = vsel %vm65_vm0, %v944_v0, 0.0  ;;  %v901_v0 = vld [vmem:[#allocation2] sm:$0xff] }
 0x385   :  { %v965_v17 = vrot.slane %v964_v3, 4  ;;  %v930_v5 = vpop.permute.xlu1 %929  ;;  %v974_v19 = vrot.slane %v973_v29, 2  ;;  %v955_v27 = vrot.slane %v954_v16, 1  ;;  %v963_v44 = vadd.f32 %v962_v30, %v961_v18 }
 0x386   :  { %v947_v6 = vmul.f32 %v930_v5, %v1449_v40 }
 0x387   :  { %v966_v9 = vadd.f32 %v965_v17, %v964_v3  ;;  %v975_v31 = vadd.f32 %v974_v19, %v973_v29  ;;  %v956_v39 = vadd.f32 %v955_v27, %v954_v16 }
 0x388   :  { %v985_v12 = vsel %vm65_vm0, %v947_v6, 0.0 }
 0x389   :  { %v967_v13 = vrot.slane %v966_v9, 2  ;;  %v986_v14 = vrot.slane %v985_v12, 4  ;;  %v925_v15 = vpop.permute.xlu1 %924  ;;  %v1015_v51 = vsel %vm1014_vm12, %v963_v44, %v956_v39 }
 0x38a   :  { %v946_v22 = vmul.f32 %v925_v15, %v1442_v36 }
 0x38b   :  { %v968_v20 = vadd.f32 %v967_v13, %v966_v9  ;;  %v987_v24 = vadd.f32 %v986_v14, %v985_v12 }
 0x38c   :  { %v978_v21 = vsel %vm65_vm0, %v946_v22, 0.0 }
 0x38d   :  { %v979_v25 = vrot.slane %v978_v21, 4  ;;  %v935_v40 = vpop.permute.xlu1 %934  ;;  %v969_v33 = vrot.slane %v968_v20, 1  ;;  %v988_v35 = vrot.slane %v987_v24, 2 }
 0x38e   :  { %v948_v26 = vmul.f32 %v935_v40, %v1456_v43  ;;  %v976_v43 = vrot.slane %v975_v31, 1 }
 0x38f   :  { %v980_v28 = vadd.f32 %v979_v25, %v978_v21  ;;  %v970_v45 = vadd.f32 %v969_v33, %v968_v20  ;;  %v989_v47 = vadd.f32 %v988_v35, %v987_v24 }
 0x390   :  { %v992_v34 = vsel %vm65_vm0, %v948_v26, 0.0  ;;  %v977_v55 = vadd.f32 %v976_v43, %v975_v31 }
 0x391   :  { %v981_v36 = vrot.slane %v980_v28, 2  ;;  %v993_v37 = vrot.slane %v992_v34, 4  ;;  %v940_v38 = vpop.permute.xlu1 %939  ;;  %v1017_v54 = vsel %vm1016_vm13, %v970_v45, %v1015_v51  ;;  %v990_v56 = vrot.slane %v989_v47, 1 }
 0x392   :  { %v949_v32 = vmul.f32 %v940_v38, %v1463_v46  ;;  %v1019_v59 = vsel %vm1018_vm14, %v977_v55, %v1017_v54 }
 0x393   :  { %v982_v41 = vadd.f32 %v981_v36, %v980_v28  ;;  %v994_v42 = vadd.f32 %v993_v37, %v992_v34  ;;  %v991_v62 = vadd.f32 %v990_v56, %v989_v47 }
 0x394   :  { %v999_v7 = vsel %vm65_vm0, %v949_v32, 0.0 }
 0x395   :  { %v983_v48 = vrot.slane %v982_v41, 1  ;;  %v995_v49 = vrot.slane %v994_v42, 2  ;;  %v1000_v50 = vrot.slane %v999_v7, 4 }
 0x397   :  { %v996_v52 = vadd.f32 %v995_v49, %v994_v42  ;;  %v1001_v53 = vadd.f32 %v1000_v50, %v999_v7  ;;  %v984_v46 = vadd.f32 %v983_v48, %v982_v41 }
 0x399   :  { %v997_v57 = vrot.slane %v996_v52, 1  ;;  %v1002_v58 = vrot.slane %v1001_v53, 2  ;;  %v1021_v10 = vsel %vm1020_vm15, %v984_v46, %v1019_v59 }
 0x39a   :  { %v1023_v4 = vsel %vm1022_vm1, %v991_v62, %v1021_v10 }
 0x39b   :  { %v1003_v60 = vadd.f32 %v1002_v58, %v1001_v53  ;;  %v998_v61 = vadd.f32 %v997_v57, %v996_v52 }
 0x39d   :  { %v1004_v63 = vrot.slane %v1003_v60, 1  ;;  %v1025_v2 = vsel %vm1024_vm2, %v998_v61, %v1023_v4 }
 0x39f   :  { %v1005_v1 = vadd.f32 %v1004_v63, %v1003_v60 }
 0x3a1   :  { %v1027_v23 = vsel %vm1026_vm3, %v1005_v1, %v1025_v2 }
 0x3a2   :  { %v1029_v3 = vadd.f32 %v1027_v23, %v901_v0 }
 0x3a4   :  { %1030 = vst.msk [vmem:[#allocation2] sm:$0xff] %vm65_vm0, %v1029_v3 }
 0x3ab   :  { %v1034_v17 = vld [vmem:[#allocation2] sm:$0xff] }
 0x3ac   :  { %1035 = vst.msk [vmem:[%s1623_s10] sm:$0xff] %vm65_vm0, %v1034_v17 }
 0x3ad   :  { %1040 = vsyncpa [#allocation5], 1 }
 0x3ae   :  { %1041 = vsyncpa [#allocation7], 1 }

</bundles_post_ra>
